<compile_context>
chip_gen: v5e
topology: v5e:2x2
jax: 0.10.0
libtpu: 0.0.40
codegen_flags: <defaults>
</compile_context>

<pallas_src>
import functools

import jax
import jax.numpy as jnp
from jax.experimental import pallas as pl
from jax.experimental.pallas import tpu as pltpu

LANES = 128
MAX_BLOCK_ROWS = 4096      # 4096x128 f32 = 2 MiB / stream / buffer
_BCE_LOG_CLAMP = -100.0    # PyTorch binary_cross_entropy clamps log at -100
_LOGIT_PAD = -100.0        # neutral logit pad: sigmoid ~ 0, softplus ~ 0


def _round_up(a, b):
    return ((a + b - 1) // b) * b


def _num_tensorcores():
    """Best-effort TensorCore-per-chip count (2 on v7x); falls back to 1."""
    try:
        info = pltpu.get_tpu_info()
    except Exception:
        return 1
    for name in ("num_cores", "core_count", "num_tensorcores",
                 "tensorcore_count", "cores_per_chip", "num_cores_per_chip"):
        val = getattr(info, name, None)
        if isinstance(val, int) and 1 <= val <= 8:
            return val
    return 1


def _dice_bce_sums_kernel(x_ref, t_ref, o_ref, acc_ref, *,
                          rows, block_rows, blocks_per_slice,
                          from_logits, need_row_mask):
    i = pl.program_id(1)

    @pl.when(i == 0)
    def _():
        acc_ref[...] = jnp.zeros_like(acc_ref)

    x = x_ref[...].astype(jnp.float32)
    t = t_ref[...].astype(jnp.float32)

    if need_row_mask:
        # Only emitted when the grid does not tile `rows` exactly: force the
        # out-of-range rows of the ragged/overflow blocks to neutral values
        # (everything downstream then contributes exactly zero).
        c = pl.program_id(0)
        start = (c * blocks_per_slice + i) * block_rows
        row = start + jax.lax.broadcasted_iota(jnp.int32, x.shape, 0)
        valid = row < rows
        x = jnp.where(valid, x, jnp.float32(_LOGIT_PAD if from_logits else 0.0))
        t = jnp.where(valid, t, 0.0)

    if from_logits:
        # p = sigmoid(x); BCE in its fused BCEWithLogits form.
        # TODO(synk): the reference clamps log(p) at -100, which only differs
        # for |logit| > 100; the fused form matches everywhere else.
        e = jnp.exp(-jnp.abs(x))
        p = jnp.where(x >= 0.0, 1.0, e) / (1.0 + e)
        bce_acc = jnp.maximum(x, 0.0) - x * t + jnp.log1p(e)     # = +bce_i
    else:
        p = x
        log_p = jnp.maximum(jnp.log(x), _BCE_LOG_CLAMP)
        log_1mp = jnp.maximum(jnp.log(1.0 - x), _BCE_LOG_CLAMP)
        bce_acc = log_1mp + t * (log_p - log_1mp)                # = -bce_i

    def slab(v):  # (block_rows, 128) -> (8, 128) via whole-vreg adds
        return jnp.sum(v.reshape(block_rows // 8, 8, LANES), axis=0)

    acc_ref[0, :, :] += slab(p * t)
    acc_ref[1, :, :] += slab(p)
    acc_ref[2, :, :] += slab(t)
    acc_ref[3, :, :] += slab(bce_acc)

    @pl.when(i == pl.num_programs(1) - 1)
    def _():
        o_ref[0, :, :, :] = acc_ref[...]


def dice_bce_loss(inputs, targets, smooth=0.1, from_logits=False):
    """Pallas-TPU implementation of DiceBCELoss.forward."""
    x = jnp.ravel(inputs)              # native dtype; cast happens in-kernel
    t = jnp.ravel(targets)
    n = x.shape[0]

    # Sublane packing of the narrowest stream (8 f32 / 16 bf16 / 32 int8).
    itemsize = min(jnp.dtype(x.dtype).itemsize, jnp.dtype(t.dtype).itemsize)
    packing = max(8, 32 // max(1, itemsize))

    rows = max(_round_up(n, LANES) // LANES, packing)
    pad = rows * LANES - n
    if pad:  # only the <=127-elem lane tail or a tiny (< packing rows) input
        pad_x = jnp.full((pad,), _LOGIT_PAD if from_logits else 0.0, x.dtype)
        x = jnp.concatenate([x, pad_x])
        t = jnp.concatenate([t, jnp.zeros((pad,), t.dtype)])
    x = x.reshape(rows, LANES)
    t = t.reshape(rows, LANES)

    num_slices = _num_tensorcores()
    if rows < num_slices * packing:
        num_slices = 1
    per_slice = -(-rows // num_slices)
    block_rows = min(MAX_BLOCK_ROWS,
                     _round_up(per_slice, packing),
                     (rows // packing) * packing)
    num_blocks = -(-rows // block_rows)
    blocks_per_slice = -(-num_blocks // num_slices)
    need_row_mask = num_slices * blocks_per_slice * block_rows != rows

    in_spec = pl.BlockSpec((block_rows, LANES),
                           lambda c, i: (c * blocks_per_slice + i, 0))

    if num_slices > 1 and hasattr(pltpu, "CORE_PARALLEL"):
        dim_sem = (pltpu.CORE_PARALLEL, pltpu.ARBITRARY)
    elif num_slices > 1:
        dim_sem = ("parallel", "arbitrary")
    else:
        dim_sem = ("arbitrary", "arbitrary")

    partial = pl.pallas_call(
        functools.partial(_dice_bce_sums_kernel, rows=rows,
                          block_rows=block_rows,
                          blocks_per_slice=blocks_per_slice,
                          from_logits=from_logits,
                          need_row_mask=need_row_mask),
        out_shape=jax.ShapeDtypeStruct((num_slices, 4, 8, LANES), jnp.float32),
        grid_spec=pltpu.PrefetchScalarGridSpec(
            num_scalar_prefetch=0,
            grid=(num_slices, blocks_per_slice),
            in_specs=[in_spec, in_spec],
            out_specs=pl.BlockSpec((1, 4, 8, LANES), lambda c, i: (c, 0, 0, 0)),
            scratch_shapes=[pltpu.VMEM((4, 8, LANES), jnp.float32)],
        ),
        compiler_params=pltpu.CompilerParams(dimension_semantics=dim_sem),
    )(x, t)

    # Tiny epilogue: slab + slice reduction and scalar combine in plain JAX.
    sums = jnp.sum(partial, axis=(0, 2, 3))  # [sum p*t, sum p, sum t, bce acc]
    intersection, sum_p, sum_t, bce_raw = sums[0], sums[1], sums[2], sums[3]
    dice_loss = 1.0 - (2.0 * intersection + smooth) / (sum_p + sum_t + smooth)
    sum_bce = bce_raw if from_logits else -bce_raw
    bce_loss = sum_bce / jnp.float32(n)
    return bce_loss + dice_loss


def _reference_dice_bce(inputs, targets, smooth=0.1, from_logits=False):
    x = jnp.ravel(inputs).astype(jnp.float32)
    t = jnp.ravel(targets).astype(jnp.float32)
    if from_logits:
        x = jax.nn.sigmoid(x)
    intersection = jnp.sum(x * t)
    dice = 1.0 - (2.0 * intersection + smooth) / (jnp.sum(x) + jnp.sum(t) + smooth)
    log_p = jnp.maximum(jnp.log(x), _BCE_LOG_CLAMP)
    log_1mp = jnp.maximum(jnp.log(1.0 - x), _BCE_LOG_CLAMP)
    bce = jnp.mean(-(t * log_p + (1.0 - t) * log_1mp))
    return bce + dice


if __name__ == "__main__":
    key = jax.random.PRNGKey(0)
    k_in, k_tgt, k_logit, k_in2, k_tgt2 = jax.random.split(key, 5)

    # Probability inputs (from_logits=False, the PyTorch default).
    shape = (2, 4, 16, 16)
    inputs = jax.random.uniform(k_in, shape, jnp.float32,
                                minval=1e-4, maxval=1.0 - 1e-4)
    targets = jax.random.bernoulli(k_tgt, 0.5, shape).astype(jnp.float32)
    loss = jax.block_until_ready(dice_bce_loss(inputs, targets, smooth=0.1))
    ref = _reference_dice_bce(inputs, targets, smooth=0.1)
    assert jnp.allclose(loss, ref, rtol=1e-4, atol=1e-5), (loss, ref)

    # Logits path (moderate logits).
    logits = jax.random.normal(k_logit, shape, jnp.float32) * 3.0
    loss_l = jax.block_until_ready(
        dice_bce_loss(logits, targets, smooth=0.1, from_logits=True))
    ref_l = _reference_dice_bce(logits, targets, smooth=0.1, from_logits=True)
    assert jnp.allclose(loss_l, ref_l, rtol=1e-4, atol=1e-5), (loss_l, ref_l)

    # Ragged element count: exercises lane-tail padding + in-kernel row mask.
    shape2 = (3, 5, 7, 11)
    inputs2 = jax.random.uniform(k_in2, shape2, jnp.float32,
                                 minval=1e-4, maxval=1.0 - 1e-4)
    targets2 = jax.random.bernoulli(k_tgt2, 0.5, shape2).astype(jnp.float32)
    loss2 = jax.block_until_ready(dice_bce_loss(inputs2, targets2, smooth=0.1))
    ref2 = _reference_dice_bce(inputs2, targets2, smooth=0.1)
    assert jnp.allclose(loss2, ref2, rtol=1e-4, atol=1e-5), (loss2, ref2)

    logits2 = inputs2 * 6.0 - 3.0
    loss2l = jax.block_until_ready(
        dice_bce_loss(logits2, targets2, smooth=0.1, from_logits=True))
    ref2l = _reference_dice_bce(logits2, targets2, smooth=0.1, from_logits=True)
    assert jnp.allclose(loss2l, ref2l, rtol=1e-4, atol=1e-5), (loss2l, ref2l)

    print("KERNEL_OK")
</pallas_src>

<mosaic_0001>
module attributes {stable_mosaic.version = 11 : i64} {
  func.func @_dice_bce_sums_kernel(%arg0: i32, %arg1: i32, %arg2: memref<16x128xf32, #tpu.memory_space<vmem>>, %arg3: memref<16x128xf32, #tpu.memory_space<vmem>>, %arg4: memref<1x4x8x128xf32, #tpu.memory_space<vmem>>, %arg5: memref<4x8x128xf32, #tpu.memory_space<vmem>>) attributes {dimension_semantics = [#tpu.dimension_semantics<arbitrary>, #tpu.dimension_semantics<arbitrary>], iteration_bounds = array<i64: 1, 1>, scalar_prefetch = 0 : i64, scratch_operands = 1 : i64, tpu.core_type = #tpu.core_type<tc>, window_params = [{transform_indices = @transform_0, window_bounds = array<i64: 16, 128>}, {transform_indices = @transform_1, window_bounds = array<i64: 16, 128>}, {transform_indices = @transform_2, window_bounds = array<i64: 1, 4, 8, 128>}]} {
    %c0_i32 = arith.constant 0 : i32
    %0 = arith.cmpi eq, %arg1, %c0_i32 : i32
    %1 = arith.extui %0 : i1 to i32
    %c0_i32_0 = arith.constant 0 : i32
    %2 = arith.cmpi ne, %1, %c0_i32_0 : i32
    scf.if %2 {
      %cst_33 = arith.constant 0.000000e+00 : f32
      %52 = vector.broadcast %cst_33 : f32 to vector<4x8x128xf32>
      %c0_34 = arith.constant 0 : index
      %c0_35 = arith.constant 0 : index
      %c0_36 = arith.constant 0 : index
      %53 = vector.load %arg5[%c0_34, %c0_35, %c0_36] : memref<4x8x128xf32, #tpu.memory_space<vmem>>, vector<4x8x128xf32>
      tpu.vector_store %arg5[%c0_34, %c0_35, %c0_36], %52 {strides = array<i32>} : memref<4x8x128xf32, #tpu.memory_space<vmem>>, vector<4x8x128xf32>,
    } else {
    }
    %c0 = arith.constant 0 : index
    %c0_1 = arith.constant 0 : index
    %3 = vector.load %arg2[%c0, %c0_1] : memref<16x128xf32, #tpu.memory_space<vmem>>, vector<16x128xf32>
    %c0_2 = arith.constant 0 : index
    %c0_3 = arith.constant 0 : index
    %4 = vector.load %arg3[%c0_2, %c0_3] : memref<16x128xf32, #tpu.memory_space<vmem>>, vector<16x128xf32>
    %5 = math.log %3 : vector<16x128xf32>
    %cst = arith.constant -1.000000e+02 : f32
    %6 = vector.broadcast %cst : f32 to vector<16x128xf32>
    %7 = arith.maximumf %5, %6 : vector<16x128xf32>
    %cst_4 = arith.constant 1.000000e+00 : f32
    %8 = vector.broadcast %cst_4 : f32 to vector<16x128xf32>
    %9 = arith.subf %8, %3 : vector<16x128xf32>
    %10 = math.log %9 : vector<16x128xf32>
    %cst_5 = arith.constant -1.000000e+02 : f32
    %11 = vector.broadcast %cst_5 : f32 to vector<16x128xf32>
    %12 = arith.maximumf %10, %11 : vector<16x128xf32>
    %13 = arith.subf %7, %12 : vector<16x128xf32>
    %14 = arith.mulf %4, %13 : vector<16x128xf32>
    %15 = arith.addf %12, %14 : vector<16x128xf32>
    %c0_6 = arith.constant 0 : index
    %c0_7 = arith.constant 0 : index
    %c0_8 = arith.constant 0 : index
    %16 = vector.load %arg5[%c0_6, %c0_7, %c0_8] : memref<4x8x128xf32, #tpu.memory_space<vmem>>, vector<1x8x128xf32>
    %17 = vector.shape_cast %16 : vector<1x8x128xf32> to vector<8x128xf32>
    %18 = arith.mulf %3, %4 : vector<16x128xf32>
    %19 = vector.shape_cast %18 : vector<16x128xf32> to vector<2x8x128xf32>
    %cst_9 = arith.constant dense<0.000000e+00> : vector<8x128xf32>
    %20 = vector.multi_reduction <add>, %19, %cst_9 [0] : vector<2x8x128xf32> to vector<8x128xf32>
    %21 = arith.addf %17, %20 : vector<8x128xf32>
    %c0_10 = arith.constant 0 : index
    %c0_11 = arith.constant 0 : index
    %c0_12 = arith.constant 0 : index
    %22 = vector.load %arg5[%c0_10, %c0_11, %c0_12] : memref<4x8x128xf32, #tpu.memory_space<vmem>>, vector<1x8x128xf32>
    %23 = vector.shape_cast %22 : vector<1x8x128xf32> to vector<8x128xf32>
    %24 = vector.shape_cast %21 : vector<8x128xf32> to vector<1x8x128xf32>
    tpu.vector_store %arg5[%c0_10, %c0_11, %c0_12], %24 {strides = array<i32>} : memref<4x8x128xf32, #tpu.memory_space<vmem>>, vector<1x8x128xf32>,
    %c1 = arith.constant 1 : index
    %c0_13 = arith.constant 0 : index
    %c0_14 = arith.constant 0 : index
    %25 = vector.load %arg5[%c1, %c0_13, %c0_14] : memref<4x8x128xf32, #tpu.memory_space<vmem>>, vector<1x8x128xf32>
    %26 = vector.shape_cast %25 : vector<1x8x128xf32> to vector<8x128xf32>
    %27 = vector.shape_cast %3 : vector<16x128xf32> to vector<2x8x128xf32>
    %cst_15 = arith.constant dense<0.000000e+00> : vector<8x128xf32>
    %28 = vector.multi_reduction <add>, %27, %cst_15 [0] : vector<2x8x128xf32> to vector<8x128xf32>
    %29 = arith.addf %26, %28 : vector<8x128xf32>
    %c1_16 = arith.constant 1 : index
    %c0_17 = arith.constant 0 : index
    %c0_18 = arith.constant 0 : index
    %30 = vector.load %arg5[%c1_16, %c0_17, %c0_18] : memref<4x8x128xf32, #tpu.memory_space<vmem>>, vector<1x8x128xf32>
    %31 = vector.shape_cast %30 : vector<1x8x128xf32> to vector<8x128xf32>
    %32 = vector.shape_cast %29 : vector<8x128xf32> to vector<1x8x128xf32>
    tpu.vector_store %arg5[%c1_16, %c0_17, %c0_18], %32 {strides = array<i32>} : memref<4x8x128xf32, #tpu.memory_space<vmem>>, vector<1x8x128xf32>,
    %c2 = arith.constant 2 : index
    %c0_19 = arith.constant 0 : index
    %c0_20 = arith.constant 0 : index
    %33 = vector.load %arg5[%c2, %c0_19, %c0_20] : memref<4x8x128xf32, #tpu.memory_space<vmem>>, vector<1x8x128xf32>
    %34 = vector.shape_cast %33 : vector<1x8x128xf32> to vector<8x128xf32>
    %35 = vector.shape_cast %4 : vector<16x128xf32> to vector<2x8x128xf32>
    %cst_21 = arith.constant dense<0.000000e+00> : vector<8x128xf32>
    %36 = vector.multi_reduction <add>, %35, %cst_21 [0] : vector<2x8x128xf32> to vector<8x128xf32>
    %37 = arith.addf %34, %36 : vector<8x128xf32>
    %c2_22 = arith.constant 2 : index
    %c0_23 = arith.constant 0 : index
    %c0_24 = arith.constant 0 : index
    %38 = vector.load %arg5[%c2_22, %c0_23, %c0_24] : memref<4x8x128xf32, #tpu.memory_space<vmem>>, vector<1x8x128xf32>
    %39 = vector.shape_cast %38 : vector<1x8x128xf32> to vector<8x128xf32>
    %40 = vector.shape_cast %37 : vector<8x128xf32> to vector<1x8x128xf32>
    tpu.vector_store %arg5[%c2_22, %c0_23, %c0_24], %40 {strides = array<i32>} : memref<4x8x128xf32, #tpu.memory_space<vmem>>, vector<1x8x128xf32>,
    %c3 = arith.constant 3 : index
    %c0_25 = arith.constant 0 : index
    %c0_26 = arith.constant 0 : index
    %41 = vector.load %arg5[%c3, %c0_25, %c0_26] : memref<4x8x128xf32, #tpu.memory_space<vmem>>, vector<1x8x128xf32>
    %42 = vector.shape_cast %41 : vector<1x8x128xf32> to vector<8x128xf32>
    %43 = vector.shape_cast %15 : vector<16x128xf32> to vector<2x8x128xf32>
    %cst_27 = arith.constant dense<0.000000e+00> : vector<8x128xf32>
    %44 = vector.multi_reduction <add>, %43, %cst_27 [0] : vector<2x8x128xf32> to vector<8x128xf32>
    %45 = arith.addf %42, %44 : vector<8x128xf32>
    %c3_28 = arith.constant 3 : index
    %c0_29 = arith.constant 0 : index
    %c0_30 = arith.constant 0 : index
    %46 = vector.load %arg5[%c3_28, %c0_29, %c0_30] : memref<4x8x128xf32, #tpu.memory_space<vmem>>, vector<1x8x128xf32>
    %47 = vector.shape_cast %46 : vector<1x8x128xf32> to vector<8x128xf32>
    %48 = vector.shape_cast %45 : vector<8x128xf32> to vector<1x8x128xf32>
    tpu.vector_store %arg5[%c3_28, %c0_29, %c0_30], %48 {strides = array<i32>} : memref<4x8x128xf32, #tpu.memory_space<vmem>>, vector<1x8x128xf32>,
    %c0_i32_31 = arith.constant 0 : i32
    %49 = arith.cmpi eq, %arg1, %c0_i32_31 : i32
    %50 = arith.extui %49 : i1 to i32
    %c0_i32_32 = arith.constant 0 : i32
    %51 = arith.cmpi ne, %50, %c0_i32_32 : i32
    scf.if %51 {
      %c0_33 = arith.constant 0 : index
      %c0_34 = arith.constant 0 : index
      %c0_35 = arith.constant 0 : index
      %52 = vector.load %arg5[%c0_33, %c0_34, %c0_35] : memref<4x8x128xf32, #tpu.memory_space<vmem>>, vector<4x8x128xf32>
      %c0_36 = arith.constant 0 : index
      %c0_37 = arith.constant 0 : index
      %c0_38 = arith.constant 0 : index
      %c0_39 = arith.constant 0 : index
      %53 = vector.load %arg4[%c0_36, %c0_37, %c0_38, %c0_39] : memref<1x4x8x128xf32, #tpu.memory_space<vmem>>, vector<1x4x8x128xf32>
      %54 = vector.shape_cast %53 : vector<1x4x8x128xf32> to vector<4x8x128xf32>
      %55 = vector.shape_cast %52 : vector<4x8x128xf32> to vector<1x4x8x128xf32>
      tpu.vector_store %arg4[%c0_36, %c0_37, %c0_38, %c0_39], %55 {strides = array<i32>} : memref<1x4x8x128xf32, #tpu.memory_space<vmem>>, vector<1x4x8x128xf32>,
    } else {
    }
    return
  }
  func.func @transform_0(%arg0: i32, %arg1: i32) -> (i32, i32) {
    %c1_i32 = arith.constant 1 : i32
    %0 = arith.muli %arg0, %c1_i32 : i32
    %1 = arith.addi %0, %arg1 : i32
    %c0_i32 = arith.constant 0 : i32
    %c0_i32_0 = arith.constant 0 : i32
    return %1, %c0_i32 : i32, i32
  }
  func.func @transform_1(%arg0: i32, %arg1: i32) -> (i32, i32) {
    %c1_i32 = arith.constant 1 : i32
    %0 = arith.muli %arg0, %c1_i32 : i32
    %1 = arith.addi %0, %arg1 : i32
    %c0_i32 = arith.constant 0 : i32
    %c0_i32_0 = arith.constant 0 : i32
    return %1, %c0_i32 : i32, i32
  }
  func.func @transform_2(%arg0: i32, %arg1: i32) -> (i32, i32, i32, i32) {
    %c0_i32 = arith.constant 0 : i32
    %c0_i32_0 = arith.constant 0 : i32
    %c0_i32_1 = arith.constant 0 : i32
    %c0_i32_2 = arith.constant 0 : i32
    return %arg0, %c0_i32, %c0_i32_0, %c0_i32_1 : i32, i32, i32, i32
  }
}

</mosaic_0001>

<bundles_post_ra>
// kernel: tpu_custom_call.1
= control target key start
LH: loop header
LB: loop body
LE: loop exit
PB: predicated region body
PF: predicated region fallthrough
CT: control target
= control target key end

     0   :  { %7 = vsyncpa [#allocation4], 0  ;;  %s269_s0 = inlined_call_operand.hbm [shape: f32[16,128], index: 0, kind: input, shape index: {}]   ;;  %s270_s1 = inlined_call_operand.hbm [shape: f32[16,128], index: 1, kind: input, shape index: {}]   ;;  %s271_s2 = inlined_call_operand.hbm [shape: f32[1,4,8,128], index: 2, kind: output, shape index: {}]  }
   0x1   :  { %8 = vsyncpa [#allocation7], 0 }
   0x2   :  { %9 = vsyncpa [#allocation5], 0  ;;  %s18_s11 = sshll.u32 %s269_s0, 4  ;;  %s231_s12 = smov [#allocation3]   ;;  %s19_s11 = int_to_ptr.hbm [resolvable:$true] %s18_s11 }
   0x3   :  { %s20_s13 = sshll.u32 %s231_s12, 4  ;;  %s35_s16 = sshll.u32 %s270_s1, 4  ;;  %s21_s13 = int_to_ptr.vmem [resolvable:$true] %s20_s13  ;;  %s36_s16 = int_to_ptr.hbm [resolvable:$true] %s35_s16 }
   0x4   :  { %s232_s17 = smov 128   ;;  %s233_s18 = smov 8  }
   0x5   :  { %26 = dma.hbm_to_vmem [thread:$0]  %s19_s11, 256, %s21_s13, [#allocation4], %s232_s17, %s232_s17, %s233_s18  }
   0x6   :  { %s234_s19 = smov [#allocation6]  }
   0x7   :  { %s37_s20 = sshll.u32 %s234_s19, 4  ;;  %s38_s20 = int_to_ptr.vmem [resolvable:$true] %s37_s20 }
   0x8   :  { %43 = dma.hbm_to_vmem [thread:$0]  %s36_s16, 256, %s38_s20, [#allocation7], %s232_s17, %s232_s17, %s233_s18  }
   0x9   :  { %225 = dma.done.wait [#allocation4], 256  }
   0xa   :  { %226 = vsyncadd [#allocation4], 4294967040 }
   0xb   :  { %227 = dma.done.wait [#allocation7], 256  }
   0xc   :  { %228 = vsyncadd [#allocation7], 4294967040  ;;  %v64_v0 = vld [vmem:[#allocation3] sm:$0xff]  ;;  %v65_v1 = vld [vmem:[#allocation3 + $0x8] sm:$0xff]  ;;  %s235_s0 = smov [#allocation8]   ;;  %s126_s23 = sshll.u32 %s271_s2, 4  ;;  %s127_s23 = int_to_ptr.hbm [resolvable:$true] %s126_s23 }
   0xd   :  { %v66_v2 = vld [vmem:[#allocation6] sm:$0xff]  ;;  %v67_v3 = vld [vmem:[#allocation6 + $0x8] sm:$0xff]  ;;  %145 = vlog2.f32 %v64_v0  ;;  %v96_v5 = vadd.f32 %v65_v1, %v64_v0  ;;  %v74_v6 = vsub.f32 1.0, %v64_v0  ;;  %v75_v9 = vsub.f32 1.0, %v65_v1  ;;  %s124_s1 = sshll.u32 %s235_s0, 4  ;;  %s125_s1 = int_to_ptr.vmem [resolvable:$true] %s124_s1 }
   0xe   :  { %v89_v4 = vmul.f32 %v66_v2, %v64_v0  ;;  %147 = vlog2.f32 %v65_v1  ;;  %v90_v7 = vmul.f32 %v67_v3, %v65_v1  ;;  %v101_v8 = vadd.f32 %v67_v3, %v66_v2 }
   0xf   :  { %117 = vst [vmem:[#allocation8 + $0x8] sm:$0xff] %v96_v5  ;;  %149 = vlog2.f32 %v74_v6 }
  0x10   :  { %v91_v10 = vadd.f32 %v90_v7, %v89_v4  ;;  %118 = vst [vmem:[#allocation8 + $0x10] sm:$0xff] %v101_v8  ;;  %151 = vlog2.f32 %v75_v9 }
  0x12   :  { %116 = vst [vmem:[#allocation8] sm:$0xff] %v91_v10 }
  0x13   :  { %v146_v11 = vpop.eup %145 }
  0x14   :  { %v148_v12 = vpop.eup %147  ;;  %v69_v13 = vmul.f32 0.6931472, %v146_v11 }
  0x15   :  { %v150_v14 = vpop.eup %149  ;;  %v71_v15 = vmul.f32 0.6931472, %v148_v12 }
  0x16   :  { %v152_v16 = vpop.eup %151  ;;  %v72_v17 = vmax.f32 %v69_v13, -100.0  ;;  %v77_v18 = vmul.f32 0.6931472, %v150_v14 }
  0x17   :  { %v73_v19 = vmax.f32 %v71_v15, -100.0  ;;  %v79_v20 = vmul.f32 0.6931472, %v152_v16 }
  0x18   :  { %v80_v21 = vmax.f32 %v77_v18, -100.0 }
  0x19   :  { %v81_v22 = vmax.f32 %v79_v20, -100.0 }
  0x1a   :  { %v82_v23 = vsub.f32 %v72_v17, %v80_v21 }
  0x1b   :  { %v83_v24 = vsub.f32 %v73_v19, %v81_v22 }
  0x1c   :  { %v84_v25 = vmul.f32 %v82_v23, %v66_v2 }
  0x1d   :  { %v85_v26 = vmul.f32 %v83_v24, %v67_v3 }
  0x1e   :  { %v86_v27 = vadd.f32 %v84_v25, %v80_v21 }
  0x1f   :  { %v87_v28 = vadd.f32 %v85_v26, %v81_v22 }
  0x21   :  { %v106_v29 = vadd.f32 %v87_v28, %v86_v27 }
  0x23   :  { %119 = vst [vmem:[#allocation8 + $0x18] sm:$0xff] %v106_v29 }
  0x24   :  { %132 = dma.vmem_to_hbm [thread:$0]  %s125_s1, 512, %s127_s23, [#allocation5], %s232_s17, %s232_s17, %s233_s18  }
  0x25   :  { %229 = dma.done.wait [#allocation5], 512  }
  0x26   :  { %230 = vsyncadd [#allocation5], 4294966784 }
  0x27   :  { %137 = vsyncpa [#allocation4], 1 }
  0x28   :  { %138 = vsyncpa [#allocation7], 1 }
  0x29   :  { %139 = vsyncpa [#allocation5], 1 }

</bundles_post_ra>
